<compile_context>
chip_gen: v7x
topology: tpu7x:2x2x1
jax: 0.10.0
libtpu: 0.0.40
codegen_flags: <defaults>
</compile_context>

<pallas_src>
import functools

import jax
import jax.numpy as jnp
from jax import lax
from jax.experimental import pallas as pl
from jax.experimental.pallas import tpu as pltpu

_EPS = 1e-6
_LANE = 128


def _round_up(x, m):
    return (x + m - 1) // m * m


def _vmem_budget_bytes():
    """~75% of this generation's physical VMEM (v5e/v6e 128 MiB, v7x 64 MiB)."""
    cap = 64 * 1024 * 1024  # conservative fallback (v7x-sized)
    try:
        cap = int(getattr(pltpu.get_tpu_info(), "vmem_capacity_bytes", cap))
    except Exception:
        pass
    return (cap * 3) // 4


def _plan_tiles(m_real, k, itemsize, n_resident, tile_m, tile_k):
    """Pick (TM, M_pad, TK) under a generation-aware VMEM budget.

    n_resident = number of (TM, M_pad) f32 slabs resident per grid step
    (gram: 2 output buffers; loss: acc scratch + 2 targetG buffers = 3).
    """
    budget = _vmem_budget_bytes()
    vmem_limit = budget + budget // 4  # scoped limit we request (< physical)

    m_aligned = _round_up(max(m_real, _LANE), _LANE)
    if tile_m is not None:
        assert tile_m % _LANE == 0, "tile_m must be a multiple of 128"
        tm = int(tile_m)
    else:
        tm = m_aligned
        if n_resident * tm * m_aligned * 4 > budget // 2:
            for cand in (512, 256, 128):
                tm = cand
                if n_resident * tm * m_aligned * 4 <= budget // 2:
                    break
            # TODO(synk): for extreme M even (128, M) slabs overflow VMEM; a
            # column-blocked Gram variant would be needed there.
    m_pad = _round_up(m_real, tm)

    if tile_k is not None:
        assert tile_k % _LANE == 0, "tile_k must be a multiple of 128"
        tk = int(tile_k)
    else:
        avail = budget - n_resident * tm * m_pad * 4
        # ~4 tile-sized X buffers of headroom: 2 pipeline buffers plus
        # in-kernel masked/cast temporaries.
        tk_cap = max(avail // (4 * m_pad * itemsize), _LANE)
        if k <= tk_cap:
            tk = k
        elif tk_cap >= 512:
            tk = (tk_cap // 512) * 512
        else:
            tk = (tk_cap // _LANE) * _LANE
    if tk >= k:
        tk, n_k, mask_k = k, 1, False
    else:
        n_k = -(-k // tk)
        mask_k = (k % tk) != 0
    return dict(tm=tm, m_pad=m_pad, tk=tk, n_k=n_k, mask_k=mask_k,
                vmem_limit=int(vmem_limit))


def _as_mxu_dtype(x):
    # Keep bf16 (halves HBM traffic, fast MXU path, f32 accumulation); cast
    # everything else to f32.
    if x.dtype in (jnp.bfloat16, jnp.float32):
        return x
    return x.astype(jnp.float32)


def _load_xtiles(x_ref, i, kk, *, tm, k, tk, mask_k):
    """Return (lhs row-block, rhs full block), K-tail masked if needed."""
    x = x_ref[...]
    valid = None
    if mask_k:
        valid = lax.broadcasted_iota(jnp.int32, x.shape, 1) < (k - kk * tk)
        x = jnp.where(valid, x, 0)
    if tm == x_ref.shape[0]:
        return x, x
    xi = x_ref[pl.ds(pl.multiple_of(i * tm, tm), tm), :]
    if mask_k:
        xi = jnp.where(valid[:tm], xi, 0)
    return xi, x


def _gram_kernel(x_ref, g_ref, *, tm, k, tk, inv_k, mask_k):
    """Accumulate X_i @ X^T directly into the resident output block."""
    i = pl.program_id(0)
    kk = pl.program_id(1)

    @pl.when(kk == 0)
    def _():
        g_ref[...] = jnp.zeros_like(g_ref)

    xi, x = _load_xtiles(x_ref, i, kk, tm=tm, k=k, tk=tk, mask_k=mask_k)
    # Contract the last (lane) dim of both operands: transposed-RHS matmul on
    # the MXU, no materialized X.T.
    g_ref[...] += lax.dot_general(
        xi, x, dimension_numbers=(((1,), (1,)), ((), ())),
        preferred_element_type=jnp.float32)

    @pl.when(kk == pl.num_programs(1) - 1)
    def _():
        g_ref[...] *= jnp.float32(inv_k)


def _gram_loss_kernel(x_ref, tg_ref, part_ref, acc_ref, tr_ref, *,
                      tm, k, tk, inv_k, mask_k):
    """Per row block: sum((acc/K - tG)^2) + 2*(eps/K)*trace_i(acc)/K."""
    i = pl.program_id(0)
    kk = pl.program_id(1)

    @pl.when(kk == 0)
    def _():
        acc_ref[...] = jnp.zeros_like(acc_ref)
        tr_ref[0] = jnp.float32(0.0)

    xi, x = _load_xtiles(x_ref, i, kk, tm=tm, k=k, tk=tk, mask_k=mask_k)
    acc_ref[...] += lax.dot_general(
        xi, x, dimension_numbers=(((1,), (1,)), ((), ())),
        preferred_element_type=jnp.float32)
    xi32 = xi.astype(jnp.float32)
    tr_ref[0] += jnp.sum(xi32 * xi32)  # running trace(X_i X_i^T)

    @pl.when(kk == pl.num_programs(1) - 1)
    def _():
        d = acc_ref[...] * jnp.float32(inv_k) - tg_ref[...]
        partial = (jnp.sum(d * d)
                   + jnp.float32(2.0 * _EPS * inv_k * inv_k) * tr_ref[0])
        # Lane-dense (8,128) block fully written with the partial value.
        part_ref[...] = jnp.full(part_ref.shape, partial, dtype=jnp.float32)


@functools.partial(jax.jit, static_argnames=(
    "m_real", "k", "tm", "m_pad", "tk", "n_k", "mask_k", "vmem_limit"))
def _gram_impl(x2d, *, m_real, k, tm, m_pad, tk, n_k, mask_k, vmem_limit):
    x2d = _as_mxu_dtype(x2d)
    if m_pad != m_real:
        x2d = jnp.pad(x2d, ((0, m_pad - m_real), (0, 0)))
    itemsize = x2d.dtype.itemsize
    kern = functools.partial(_gram_kernel, tm=tm, k=k, tk=tk,
                             inv_k=1.0 / float(k), mask_k=mask_k)
    g_pad = pl.pallas_call(
        kern,
        out_shape=jax.ShapeDtypeStruct((m_pad, m_pad), jnp.float32),
        grid_spec=pltpu.PrefetchScalarGridSpec(
            num_scalar_prefetch=0,
            grid=(m_pad // tm, n_k),
            in_specs=[pl.BlockSpec((m_pad, tk), lambda i, kk: (0, kk))],
            out_specs=pl.BlockSpec((tm, m_pad), lambda i, kk: (i, 0)),
        ),
        compiler_params=pltpu.CompilerParams(
            dimension_semantics=("parallel", "arbitrary"),
            vmem_limit_bytes=int(vmem_limit)),
        cost_estimate=pl.CostEstimate(
            flops=2 * m_pad * m_pad * n_k * tk,
            transcendentals=0,
            bytes_accessed=(m_pad // tm) * m_pad * n_k * tk * itemsize
                           + m_pad * m_pad * 4),
    )(x2d)
    g = g_pad[:m_real, :m_real]
    # eps*I/K added once here (tiny, one-time) instead of iota/select in-kernel.
    return g + jnp.float32(_EPS / float(k)) * jnp.eye(m_real, dtype=jnp.float32)


@functools.partial(jax.jit, static_argnames=(
    "m_real", "k", "tm", "m_pad", "tk", "n_k", "mask_k", "vmem_limit",
    "inv_b2"))
def _loss_impl(x2d, target_g, *, m_real, k, tm, m_pad, tk, n_k, mask_k,
               vmem_limit, inv_b2):
    x2d = _as_mxu_dtype(x2d)
    tg = target_g.astype(jnp.float32)
    if m_pad != m_real:
        x2d = jnp.pad(x2d, ((0, m_pad - m_real), (0, 0)))
        tg_pad = jnp.pad(tg, ((0, m_pad - m_real), (0, m_pad - m_real)))
    else:
        tg_pad = tg
    n_blocks = m_pad // tm
    itemsize = x2d.dtype.itemsize
    kern = functools.partial(_gram_loss_kernel, tm=tm, k=k, tk=tk,
                             inv_k=1.0 / float(k), mask_k=mask_k)
    partials = pl.pallas_call(
        kern,
        out_shape=jax.ShapeDtypeStruct((8, 128 * n_blocks), jnp.float32),
        grid_spec=pltpu.PrefetchScalarGridSpec(
            num_scalar_prefetch=0,
            grid=(n_blocks, n_k),
            in_specs=[
                pl.BlockSpec((m_pad, tk), lambda i, kk: (0, kk)),
                # TODO(synk): pl.Buffered(1) on this constant-per-row-block
                # targetG spec would save one (TM, M_pad) VMEM buffer on v7x.
                pl.BlockSpec((tm, m_pad), lambda i, kk: (i, 0)),
            ],
            out_specs=pl.BlockSpec((8, 128), lambda i, kk: (0, i)),
            scratch_shapes=[pltpu.VMEM((tm, m_pad), jnp.float32),
                            pltpu.SMEM((1,), jnp.float32)],
        ),
        compiler_params=pltpu.CompilerParams(
            dimension_semantics=("parallel", "arbitrary"),
            vmem_limit_bytes=int(vmem_limit)),
        cost_estimate=pl.CostEstimate(
            flops=2 * m_pad * m_pad * n_k * tk,
            transcendentals=0,
            bytes_accessed=n_blocks * m_pad * n_k * tk * itemsize
                           + m_pad * m_pad * 4),
    )(x2d, tg_pad)
    eps_k = jnp.float32(_EPS / float(k))
    # loss*b^2 = sum_i partial_i - 2*(eps/K)*trace(targetG) + M*(eps/K)^2
    loss = (jnp.sum(partials[0, ::128])
            + jnp.float32(m_real) * eps_k * eps_k
            - 2.0 * eps_k * jnp.trace(tg))
    return loss * jnp.float32(inv_b2)


# ---------- small-problem fallbacks (grid/DMA overhead not worth it) ----------
@jax.jit
def _gram_jnp(x2d):
    m, k = x2d.shape
    x = x2d.astype(jnp.float32)
    g = jnp.dot(x, x.T, precision=lax.Precision.HIGHEST)
    return (g + _EPS * jnp.eye(m, dtype=jnp.float32)) / float(k)


@functools.partial(jax.jit, static_argnames=("channels",))
def _loss_jnp(x2d, target_g, *, channels):
    g = _gram_jnp(x2d)
    diff = g - target_g.astype(jnp.float32)
    return jnp.sum(diff * diff) / float(channels) ** 2


# ------------------------------- public API ----------------------------------
def gram_matrix_pallas(x2d, *, tile_m=None, tile_k=None):
    """G = (X @ X^T + eps*I) / K for X of shape (M, K)."""
    m_real, k = x2d.shape
    if tile_m is None and tile_k is None and m_real < _LANE:
        return _gram_jnp(x2d)
    itemsize = 2 if x2d.dtype == jnp.bfloat16 else 4
    plan = _plan_tiles(m_real, k, itemsize, n_resident=2,
                       tile_m=tile_m, tile_k=tile_k)
    return _gram_impl(x2d, m_real=m_real, k=k, **plan)


def gram_loss_pallas(x2d, target_g, channels, *, tile_m=None, tile_k=None):
    """sum((gram(X) - targetG)^2) / channels^2 for X of shape (M, K)."""
    m_real, k = x2d.shape
    if tile_m is None and tile_k is None and m_real < _LANE:
        return _loss_jnp(x2d, target_g, channels=int(channels))
    itemsize = 2 if x2d.dtype == jnp.bfloat16 else 4
    plan = _plan_tiles(m_real, k, itemsize, n_resident=3,
                       tile_m=tile_m, tile_k=tile_k)
    return _loss_impl(x2d, target_g, m_real=m_real, k=k,
                      inv_b2=1.0 / float(channels) ** 2, **plan)


class TexLossGram:
    """JAX/Pallas port of the PyTorch TexLossGram constraint layer."""

    def __init__(self, target_feature, device=None):  # device kept for parity
        a, b, c, d = target_feature.shape
        X = target_feature.reshape(a * b, c * d)
        self.targetG = gram_matrix_pallas(X)
        self._channels = int(b)

    def __call__(self, x):
        a, b, c, d = x.shape
        X = x.reshape(a * b, c * d)
        # TODO(synk): storing the loss as Python attribute mirrors the PyTorch
        # module but is not jit/vmap-safe if the whole layer is traced.
        self.loss = gram_loss_pallas(X, self.targetG, int(b))
        return x  # forward returns its input unchanged (loss stored on self)


# ------------------------------- self test -----------------------------------
def _reference_loss(x, target_feature):
    a, b, c, d = target_feature.shape
    Xt = target_feature.reshape(a * b, c * d).astype(jnp.float32)
    tg = (jnp.dot(Xt, Xt.T, precision=lax.Precision.HIGHEST)
          + _EPS * jnp.eye(a * b, dtype=jnp.float32)) / (c * d)
    a, b, c, d = x.shape
    X = x.reshape(a * b, c * d).astype(jnp.float32)
    g = (jnp.dot(X, X.T, precision=lax.Precision.HIGHEST)
         + _EPS * jnp.eye(a * b, dtype=jnp.float32)) / (c * d)
    return jnp.sum((g - tg) ** 2) / (b ** 2)


if __name__ == "__main__":
    key = jax.random.PRNGKey(0)
    k1, k2, k3, k4 = jax.random.split(key, 4)

    # Case 1: Pallas path (M = 2*64 = 128 lane-aligned, K = 256).
    tgt = jax.random.normal(k1, (2, 64, 16, 16), dtype=jnp.float32)
    x = jax.random.normal(k2, (2, 64, 16, 16), dtype=jnp.float32)
    layer = TexLossGram(tgt)
    out = jax.block_until_ready(layer(x))
    loss = jax.block_until_ready(layer.loss)
    ref = _reference_loss(x, tgt)
    assert out.shape == x.shape and bool(jnp.all(out == x))
    assert jnp.allclose(loss, ref, rtol=1e-4, atol=1e-7), (loss, ref)

    # Case 2: tiny shapes -> plain-jnp fallback (M = 8).
    tgt2 = jax.random.normal(k3, (2, 4, 16, 16), dtype=jnp.float32)
    x2 = jax.random.normal(k4, (2, 4, 16, 16), dtype=jnp.float32)
    layer2 = TexLossGram(tgt2)
    _ = layer2(x2)
    loss2 = jax.block_until_ready(layer2.loss)
    ref2 = _reference_loss(x2, tgt2)
    assert jnp.allclose(loss2, ref2, rtol=1e-4, atol=1e-7), (loss2, ref2)

    # Case 3: forced small tiles -> exercises row padding (M=192 -> 256),
    # megacore M row blocking (2 blocks) and K-tail masking (K=144, TK=128).
    tgt3 = jax.random.normal(k1, (2, 96, 12, 12), dtype=jnp.float32)
    x3 = jax.random.normal(k2, (2, 96, 12, 12), dtype=jnp.float32)
    tg3 = gram_matrix_pallas(tgt3.reshape(192, 144), tile_m=128, tile_k=128)
    loss3 = gram_loss_pallas(x3.reshape(192, 144), tg3, 96,
                             tile_m=128, tile_k=128)
    loss3 = jax.block_until_ready(loss3)
    ref3 = _reference_loss(x3, tgt3)
    assert jnp.allclose(loss3, ref3, rtol=1e-4, atol=1e-7), (loss3, ref3)

    print("KERNEL_OK")
</pallas_src>

<mosaic_0001>
module attributes {stable_mosaic.version = 11 : i64} {
  func.func @_gram_kernel(%arg0: i32, %arg1: i32, %arg2: memref<128x256xf32, #tpu.memory_space<vmem>>, %arg3: memref<128x128xf32, #tpu.memory_space<vmem>>) attributes {dimension_semantics = [#tpu.dimension_semantics<parallel>, #tpu.dimension_semantics<arbitrary>], iteration_bounds = array<i64: 1, 1>, scalar_prefetch = 0 : i64, scratch_operands = 0 : i64, tpu.core_type = #tpu.core_type<tc>, window_params = [{transform_indices = @transform_0, window_bounds = array<i64: 128, 256>}, {transform_indices = @transform_1, window_bounds = array<i64: 128, 128>}]} {
    %c0_i32 = arith.constant 0 : i32
    %0 = arith.cmpi eq, %arg1, %c0_i32 : i32
    %1 = arith.extui %0 : i1 to i32
    %c0_i32_0 = arith.constant 0 : i32
    %2 = arith.cmpi ne, %1, %c0_i32_0 : i32
    scf.if %2 {
      %cst_8 = arith.constant 0.000000e+00 : f32
      %11 = vector.broadcast %cst_8 : f32 to vector<128x128xf32>
      %c0_9 = arith.constant 0 : index
      %c0_10 = arith.constant 0 : index
      %12 = vector.load %arg3[%c0_9, %c0_10] : memref<128x128xf32, #tpu.memory_space<vmem>>, vector<128x128xf32>
      tpu.vector_store %arg3[%c0_9, %c0_10], %11 {strides = array<i32>} : memref<128x128xf32, #tpu.memory_space<vmem>>, vector<128x128xf32>,
    } else {
    }
    %c0 = arith.constant 0 : index
    %c0_1 = arith.constant 0 : index
    %3 = vector.load %arg2[%c0, %c0_1] : memref<128x256xf32, #tpu.memory_space<vmem>>, vector<128x256xf32>
    %c0_2 = arith.constant 0 : index
    %c0_3 = arith.constant 0 : index
    %4 = vector.load %arg3[%c0_2, %c0_3] : memref<128x128xf32, #tpu.memory_space<vmem>>, vector<128x128xf32>
    %cst = arith.constant dense<0.000000e+00> : vector<128x128xf32>
    %5 = tpu.matmul %3, %3, %cst {dimension_numbers = #tpu.dot_dimension_numbers<[1], [1], [0], [0], [0, 0, 1, 0], [], []>} : vector<128x256xf32>, vector<128x256xf32>, vector<128x128xf32> -> vector<128x128xf32>
    %6 = arith.addf %4, %5 : vector<128x128xf32>
    %c0_4 = arith.constant 0 : index
    %c0_5 = arith.constant 0 : index
    %7 = vector.load %arg3[%c0_4, %c0_5] : memref<128x128xf32, #tpu.memory_space<vmem>>, vector<128x128xf32>
    tpu.vector_store %arg3[%c0_4, %c0_5], %6 {strides = array<i32>} : memref<128x128xf32, #tpu.memory_space<vmem>>, vector<128x128xf32>,
    %c0_i32_6 = arith.constant 0 : i32
    %8 = arith.cmpi eq, %arg1, %c0_i32_6 : i32
    %9 = arith.extui %8 : i1 to i32
    %c0_i32_7 = arith.constant 0 : i32
    %10 = arith.cmpi ne, %9, %c0_i32_7 : i32
    scf.if %10 {
      %c0_8 = arith.constant 0 : index
      %c0_9 = arith.constant 0 : index
      %11 = vector.load %arg3[%c0_8, %c0_9] : memref<128x128xf32, #tpu.memory_space<vmem>>, vector<128x128xf32>
      %cst_10 = arith.constant 3.906250e-03 : f32
      %12 = vector.broadcast %cst_10 : f32 to vector<128x128xf32>
      %13 = arith.mulf %11, %12 : vector<128x128xf32>
      %c0_11 = arith.constant 0 : index
      %c0_12 = arith.constant 0 : index
      %14 = vector.load %arg3[%c0_11, %c0_12] : memref<128x128xf32, #tpu.memory_space<vmem>>, vector<128x128xf32>
      tpu.vector_store %arg3[%c0_11, %c0_12], %13 {strides = array<i32>} : memref<128x128xf32, #tpu.memory_space<vmem>>, vector<128x128xf32>,
    } else {
    }
    return
  }
  func.func @transform_0(%arg0: i32, %arg1: i32) -> (i32, i32) {
    %c0_i32 = arith.constant 0 : i32
    %c0_i32_0 = arith.constant 0 : i32
    return %c0_i32, %arg1 : i32, i32
  }
  func.func @transform_1(%arg0: i32, %arg1: i32) -> (i32, i32) {
    %c0_i32 = arith.constant 0 : i32
    %c0_i32_0 = arith.constant 0 : i32
    return %arg0, %c0_i32 : i32, i32
  }
}

</mosaic_0001>

<bundles_post_ra>
// kernel: _gram_impl.1
= control target key start
LH: loop header
LB: loop body
LE: loop exit
PB: predicated region body
PF: predicated region fallthrough
CT: control target
= control target key end

     0   :  { %6 = vsyncpa [#allocation3], 0  ;;  %s399_s6 = smov [#allocation2]   ;;  %s532_s0 = inlined_call_operand.hbm [shape: f32[128,256], index: 0, kind: input, shape index: {}]   ;;  %s533_s1 = inlined_call_operand.vmem [shape: f32[128,128], index: 1, kind: output, shape index: {}]  }
   0x1   :  { %s12_s7 = sshll.u32 %s399_s6, 4  ;;  %s375_s10 = scalar_lea.hbm %s532_s0, 4096  ;;  %s13_s7 = int_to_ptr.vmem [resolvable:$true] %s12_s7 }
   0x2   :  { %p376_p0 = scmp.ne.s32.totalorder %s532_s0, %s375_s10  ;;  %p379_p1 = scmp.lt.u32.totalorder %s375_s10, %s532_s0 }
   0x4   :  { %p381_p2 = pnand %p379_p1, %p376_p0 }
   0x6   :  { %384 = shalt.err (!%p381_p2)
}
   0x7   :  { %s385_s15 = scalar_lea.vmem %s13_s7, 4096  ;;  %p390_p4 = scmp.lt.s32.totalorder %s13_s7, %s13_s7 }
   0x8   :  { %p386_p3 = scmp.ne.s32.totalorder %s13_s7, %s385_s15  ;;  %p391_p5 = scmp.lt.s32.totalorder %s385_s15, %s385_s15 }
   0xa   :  { %p392_p6 = por %p391_p5, %p390_p4 }
   0xc   :  { %p393_p7 = pnand %p392_p6, %p386_p3 }
   0xe   :  { %396 = shalt.err (!%p393_p7)
}
   0xf   :  { %s400_s16 = smov 256   ;;  %s401_s17 = smov 16  }
  0x10   :  { %18 = dma.hbm_to_vmem [thread:$0]  %s532_s0, 4096, %s13_s7, [#allocation3], %s400_s16, %s400_s16, %s401_s17  }
  0x11   :  { %397 = dma.done.wait [#allocation3], 4096  }
  0x12   :  { %398 = vsyncadd [#allocation3], 4294963200  ;;  %v43_v0 = vld [vmem:[#allocation2 + $0x8] sm:$0xff]  ;;  %v424_v1 = vld [vmem:[#allocation2 + $0x18] sm:$0xff] }
  0x13   :  { %v426_v2 = vld [vmem:[#allocation2] sm:$0xff]  ;;  %v323_v3 = vpack.c.bf16 %v424_v1, %v43_v0  ;;  %v429_v4 = vld [vmem:[#allocation2 + $0x10] sm:$0xff]  ;;  %v431_v5 = vld [vmem:[#allocation2 + $0x28] sm:$0xff]  ;;  %154 = vmatprep.mubr.f32.mxu0 %v43_v0 }
  0x14   :  { %v433_v6 = vld [vmem:[#allocation2 + $0x38] sm:$0xff]  ;;  %v325_v7 = vpack.c.bf16 %v429_v4, %v426_v2  ;;  %v439_v9 = vld [vmem:[#allocation2 + $0x20] sm:$0xff]  ;;  %v441_v10 = vld [vmem:[#allocation2 + $0x30] sm:$0xff] }
  0x15   :  { %v327_v8 = vpack.c.bf16 %v433_v6, %v431_v5  ;;  %324 = vmatprep.subr.bf16.mxu0 %v323_v3  ;;  %355 = vmatprep.subr.bf16.mxu1 %v323_v3  ;;  %v59_v11 = vld [vmem:[#allocation2 + $0x88] sm:$0xff]  ;;  %v445_v13 = vld [vmem:[#allocation2 + $0x58] sm:$0xff]  ;;  %v329_v14 = vpack.c.bf16 %v441_v10, %v439_v9  ;;  %v451_v16 = vld [vmem:[#allocation2 + $0x40] sm:$0xff] }
  0x16   :  { %326 = vmatpush1.bf16.xpose.msra.mxu0 %v325_v7  ;;  %363 = vmatpush1.bf16.xpose.msra.mxu1 %v325_v7  ;;  %v443_v12 = vld [vmem:[#allocation2 + $0x48] sm:$0xff]  ;;  %v453_v17 = vld [vmem:[#allocation2 + $0x50] sm:$0xff]  ;;  %v457_v19 = vld [vmem:[#allocation2 + $0x78] sm:$0xff] }
  0x17   :  { %328 = vmatprep.subr.bf16.mxu0 %v327_v8  ;;  %356 = vmatprep.subr.bf16.mxu1 %v327_v8  ;;  %v331_v15 = vpack.c.bf16 %v445_v13, %v443_v12  ;;  %v455_v18 = vld [vmem:[#allocation2 + $0x68] sm:$0xff]  ;;  %v333_v20 = vpack.c.bf16 %v453_v17, %v451_v16  ;;  %v463_v22 = vld [vmem:[#allocation2 + $0x60] sm:$0xff]  ;;  %v465_v23 = vld [vmem:[#allocation2 + $0x70] sm:$0xff] }
  0x18   :  { %194 = vmatprep.mubr.f32.mxu1 %v59_v11  ;;  %v335_v21 = vpack.c.bf16 %v457_v19, %v455_v18  ;;  %v61_v24 = vld [vmem:[#allocation2 + $0x98] sm:$0xff]  ;;  %v337_v25 = vpack.c.bf16 %v465_v23, %v463_v22  ;;  %v58_v27 = vld [vmem:[#allocation2 + $0x80] sm:$0xff]  ;;  %v60_v28 = vld [vmem:[#allocation2 + $0x90] sm:$0xff] }
  0x19   :  { %v339_v26 = vpack.c.bf16 %v61_v24, %v59_v11  ;;  %v63_v29 = vld [vmem:[#allocation2 + $0xa8] sm:$0xff]  ;;  %v65_v30 = vld [vmem:[#allocation2 + $0xb8] sm:$0xff]  ;;  %v341_v31 = vpack.c.bf16 %v60_v28, %v58_v27  ;;  %v62_v33 = vld [vmem:[#allocation2 + $0xa0] sm:$0xff] }
  0x1a   :  { %v343_v32 = vpack.c.bf16 %v65_v30, %v63_v29  ;;  %v64_v34 = vld [vmem:[#allocation2 + $0xb0] sm:$0xff]  ;;  %v67_v35 = vld [vmem:[#allocation2 + $0xc8] sm:$0xff]  ;;  %v69_v36 = vld [vmem:[#allocation2 + $0xd8] sm:$0xff] }
  0x1b   :  { %v345_v37 = vpack.c.bf16 %v64_v34, %v62_v33  ;;  %v347_v38 = vpack.c.bf16 %v69_v36, %v67_v35  ;;  %v66_v39 = vld [vmem:[#allocation2 + $0xc0] sm:$0xff]  ;;  %v68_v40 = vld [vmem:[#allocation2 + $0xd0] sm:$0xff]  ;;  %v71_v41 = vld [vmem:[#allocation2 + $0xe8] sm:$0xff] }
  0x1c   :  { %v73_v42 = vld [vmem:[#allocation2 + $0xf8] sm:$0xff]  ;;  %v349_v43 = vpack.c.bf16 %v68_v40, %v66_v39  ;;  %v70_v45 = vld [vmem:[#allocation2 + $0xe0] sm:$0xff]  ;;  %v72_v46 = vld [vmem:[#allocation2 + $0xf0] sm:$0xff] }
  0x1d   :  { %v351_v44 = vpack.c.bf16 %v73_v42, %v71_v41  ;;  %v353_v47 = vpack.c.bf16 %v72_v46, %v70_v45 }
  0x1e   :  { %330 = vmatpush1.bf16.xpose.msra.mxu0 %v329_v14  ;;  %364 = vmatpush1.bf16.xpose.msra.mxu1 %v329_v14 }
  0x1f   :  { %332 = vmatprep.subr.bf16.mxu0 %v331_v15  ;;  %357 = vmatprep.subr.bf16.mxu1 %v331_v15 }
  0x26   :  { %334 = vmatpush1.bf16.xpose.msra.mxu0 %v333_v20  ;;  %365 = vmatpush1.bf16.xpose.msra.mxu1 %v333_v20 }
  0x27   :  { %336 = vmatprep.subr.bf16.mxu0 %v335_v21  ;;  %358 = vmatprep.subr.bf16.mxu1 %v335_v21 }
  0x2e   :  { %338 = vmatpush1.bf16.xpose.msra.mxu0 %v337_v25  ;;  %366 = vmatpush1.bf16.xpose.msra.mxu1 %v337_v25 }
  0x2f   :  { %340 = vmatprep.subr.bf16.mxu0 %v339_v26  ;;  %359 = vmatprep.subr.bf16.mxu1 %v339_v26 }
  0x36   :  { %342 = vmatpush1.bf16.xpose.msra.mxu0 %v341_v31  ;;  %367 = vmatpush1.bf16.xpose.msra.mxu1 %v341_v31 }
  0x37   :  { %344 = vmatprep.subr.bf16.mxu0 %v343_v32  ;;  %360 = vmatprep.subr.bf16.mxu1 %v343_v32 }
  0x3e   :  { %346 = vmatpush1.bf16.xpose.msra.mxu0 %v345_v37  ;;  %368 = vmatpush1.bf16.xpose.msra.mxu1 %v345_v37 }
  0x3f   :  { %348 = vmatprep.subr.bf16.mxu0 %v347_v38  ;;  %361 = vmatprep.subr.bf16.mxu1 %v347_v38 }
  0x46   :  { %350 = vmatpush1.bf16.xpose.msra.mxu0 %v349_v43  ;;  %369 = vmatpush1.bf16.xpose.msra.mxu1 %v349_v43 }
  0x47   :  { %352 = vmatprep.subr.bf16.mxu0 %v351_v44  ;;  %362 = vmatprep.subr.bf16.mxu1 %v351_v44 }
  0x4e   :  { %354 = vmatpush1.bf16.xpose.msra.mxu0 %v353_v47  ;;  %370 = vmatpush1.bf16.xpose.msra.mxu1 %v353_v47 }
  0x55   :  { %155 = vmatmul.mubr.f32.vlgmr.msra.gmra.mrb[0].mxu0 %v426_v2  ;;  %195 = vmatmul.mubr.f32.vlgmr.msra.gmra.mrb[0].mxu1 %v58_v27 }
  0x56   :  { %159 = vmatprep.mubr.f32.mxu0 %v424_v1  ;;  %199 = vmatprep.mubr.f32.mxu1 %v61_v24 }
  0x59   :  { %160 = vmatmul.mubr.f32.gmra.mrb[2].mxu0 %v429_v4  ;;  %200 = vmatmul.mubr.f32.gmra.mrb[2].mxu1 %v60_v28 }
  0x5a   :  { %164 = vmatprep.mubr.f32.mxu0 %v431_v5  ;;  %204 = vmatprep.mubr.f32.mxu1 %v63_v29 }
  0x5d   :  { %165 = vmatmul.mubr.f32.gmra.mrb[4].mxu0 %v439_v9  ;;  %205 = vmatmul.mubr.f32.gmra.mrb[4].mxu1 %v62_v33 }
  0x5e   :  { %169 = vmatprep.mubr.f32.mxu0 %v433_v6  ;;  %209 = vmatprep.mubr.f32.mxu1 %v65_v30 }
  0x61   :  { %170 = vmatmul.mubr.f32.gmra.mrb[6].mxu0 %v441_v10  ;;  %210 = vmatmul.mubr.f32.gmra.mrb[6].mxu1 %v64_v34 }
  0x62   :  { %174 = vmatprep.mubr.f32.mxu0 %v443_v12  ;;  %214 = vmatprep.mubr.f32.mxu1 %v67_v35 }
  0x65   :  { %175 = vmatmul.mubr.f32.gmra.mrb[8].mxu0 %v451_v16  ;;  %215 = vmatmul.mubr.f32.gmra.mrb[8].mxu1 %v66_v39 }
  0x66   :  { %179 = vmatprep.mubr.f32.mxu0 %v445_v13  ;;  %219 = vmatprep.mubr.f32.mxu1 %v69_v36 }
  0x69   :  { %180 = vmatmul.mubr.f32.gmra.mrb[10].mxu0 %v453_v17  ;;  %220 = vmatmul.mubr.f32.gmra.mrb[10].mxu1 %v68_v40 }
  0x6a   :  { %184 = vmatprep.mubr.f32.mxu0 %v455_v18  ;;  %224 = vmatprep.mubr.f32.mxu1 %v71_v41 }
  0x6d   :  { %185 = vmatmul.mubr.f32.gmra.mrb[12].mxu0 %v463_v22  ;;  %225 = vmatmul.mubr.f32.gmra.mrb[12].mxu1 %v70_v45 }
  0x6e   :  { %189 = vmatprep.mubr.f32.mxu0 %v457_v19  ;;  %229 = vmatprep.mubr.f32.mxu1 %v73_v42 }
  0x71   :  { %190 = vmatmul.mubr.f32.gmra.mrb[14].mxu0 %v465_v23  ;;  %230 = vmatmul.mubr.f32.gmra.mrb[14].mxu1 %v72_v46 }
 0x128   :  { %v156_v48 = vpop.f32.mrb[0].mxu0  ;;  %v196_v49 = vpop.f32.mrb[0].mxu1 }
 0x129   :  { %v158_v50 = vpop.f32.mrb[1].mxu0  ;;  %v198_v51 = vpop.f32.mrb[1].mxu1  ;;  %v286_v52 = vmul.f32 0.00390625, %v156_v48  ;;  %v294_v53 = vmul.f32 0.00390625, %v196_v49 }
 0x12b   :  { %302 = vst [vmem:[%s533_s1] sm:$0xff] %v286_v52  ;;  %310 = vst [vmem:[%s533_s1 + $0x40] sm:$0xff] %v294_v53 }
 0x12c   :  { %v161_v54 = vpop.f32.mrb[2].mxu0  ;;  %v201_v55 = vpop.f32.mrb[2].mxu1 }
 0x12d   :  { %v163_v56 = vpop.f32.mrb[3].mxu0  ;;  %v203_v57 = vpop.f32.mrb[3].mxu1  ;;  %v287_v58 = vmul.f32 0.00390625, %v161_v54  ;;  %v295_v59 = vmul.f32 0.00390625, %v201_v55 }
 0x12f   :  { %303 = vst [vmem:[%s533_s1 + $0x8] sm:$0xff] %v287_v58  ;;  %311 = vst [vmem:[%s533_s1 + $0x48] sm:$0xff] %v295_v59 }
 0x130   :  { %v166_v60 = vpop.f32.mrb[4].mxu0  ;;  %v206_v61 = vpop.f32.mrb[4].mxu1 }
 0x131   :  { %v168_v62 = vpop.f32.mrb[5].mxu0  ;;  %v208_v63 = vpop.f32.mrb[5].mxu1  ;;  %v288_v0 = vmul.f32 0.00390625, %v166_v60  ;;  %v296_v1 = vmul.f32 0.00390625, %v206_v61 }
 0x133   :  { %304 = vst [vmem:[%s533_s1 + $0x10] sm:$0xff] %v288_v0  ;;  %312 = vst [vmem:[%s533_s1 + $0x50] sm:$0xff] %v296_v1 }
 0x134   :  { %v171_v2 = vpop.f32.mrb[6].mxu0  ;;  %v211_v3 = vpop.f32.mrb[6].mxu1 }
 0x135   :  { %v173_v4 = vpop.f32.mrb[7].mxu0  ;;  %v213_v5 = vpop.f32.mrb[7].mxu1  ;;  %v289_v6 = vmul.f32 0.00390625, %v171_v2  ;;  %v297_v7 = vmul.f32 0.00390625, %v211_v3 }
 0x137   :  { %305 = vst [vmem:[%s533_s1 + $0x18] sm:$0xff] %v289_v6  ;;  %313 = vst [vmem:[%s533_s1 + $0x58] sm:$0xff] %v297_v7 }
 0x138   :  { %v176_v8 = vpop.f32.mrb[8].mxu0  ;;  %v216_v9 = vpop.f32.mrb[8].mxu1 }
 0x139   :  { %v178_v10 = vpop.f32.mrb[9].mxu0  ;;  %v218_v11 = vpop.f32.mrb[9].mxu1  ;;  %v290_v12 = vmul.f32 0.00390625, %v176_v8  ;;  %v298_v13 = vmul.f32 0.00390625, %v216_v9 }
 0x13b   :  { %306 = vst [vmem:[%s533_s1 + $0x20] sm:$0xff] %v290_v12  ;;  %314 = vst [vmem:[%s533_s1 + $0x60] sm:$0xff] %v298_v13 }
 0x13c   :  { %v181_v14 = vpop.f32.mrb[10].mxu0  ;;  %v221_v15 = vpop.f32.mrb[10].mxu1 }
 0x13d   :  { %v183_v16 = vpop.f32.mrb[11].mxu0  ;;  %v223_v17 = vpop.f32.mrb[11].mxu1  ;;  %v291_v18 = vmul.f32 0.00390625, %v181_v14  ;;  %v299_v19 = vmul.f32 0.00390625, %v221_v15 }
 0x13f   :  { %307 = vst [vmem:[%s533_s1 + $0x28] sm:$0xff] %v291_v18  ;;  %315 = vst [vmem:[%s533_s1 + $0x68] sm:$0xff] %v299_v19 }
 0x140   :  { %v186_v20 = vpop.f32.mrb[12].mxu0  ;;  %v226_v21 = vpop.f32.mrb[12].mxu1 }
 0x141   :  { %v188_v22 = vpop.f32.mrb[13].mxu0  ;;  %v228_v23 = vpop.f32.mrb[13].mxu1  ;;  %v292_v24 = vmul.f32 0.00390625, %v186_v20  ;;  %v300_v25 = vmul.f32 0.00390625, %v226_v21 }
 0x143   :  { %308 = vst [vmem:[%s533_s1 + $0x30] sm:$0xff] %v292_v24  ;;  %316 = vst [vmem:[%s533_s1 + $0x70] sm:$0xff] %v300_v25 }
 0x144   :  { %v191_v26 = vpop.f32.mrb[14].mxu0  ;;  %v231_v27 = vpop.f32.mrb[14].mxu1 }
 0x145   :  { %v193_v28 = vpop.f32.mrb[15].mxu0  ;;  %v233_v29 = vpop.f32.mrb[15].mxu1  ;;  %v293_v30 = vmul.f32 0.00390625, %v191_v26  ;;  %v301_v31 = vmul.f32 0.00390625, %v231_v27 }
 0x147   :  { %309 = vst [vmem:[%s533_s1 + $0x38] sm:$0xff] %v293_v30  ;;  %317 = vst [vmem:[%s533_s1 + $0x78] sm:$0xff] %v301_v31 }
 0x148   :  { %322 = vsyncpa [#allocation3], 1 }

</bundles_post_ra>
